<compile_context>
chip_gen: v6e
topology: v6e:2x2x1
jax: 0.10.0
libtpu: 0.0.40
codegen_flags: <defaults>
</compile_context>

<pallas_src>
import functools

import jax
import jax.numpy as jnp
from jax.experimental import pallas as pl
from jax.experimental.pallas import tpu as pltpu


# Shared compiler params: 1-D parallel grids everywhere; explicit VMEM budget that
# is safe on v5e/v6e (128 MiB) and v7x (64 MiB physical).
_CPARAMS = pltpu.CompilerParams(
    dimension_semantics=("parallel",),
    vmem_limit_bytes=32 * 1024 * 1024,
)


def _pick_row_block(n):
    """Largest row tile (multiple of 8, <=512) that divides n; else n itself."""
    for cand in (512, 256, 128, 64, 32, 16, 8):
        if n % cand == 0:
            return cand
    return n


# ---------------------------------------------------------------------------
# Kernel 1: fused QKV projection   y = x @ W_qkv + b_qkv
# ---------------------------------------------------------------------------

def _qkv_kernel(x_ref, w_ref, b_ref, o_ref):
    y = jnp.dot(x_ref[...], w_ref[...], preferred_element_type=jnp.float32)
    o_ref[...] = (y + b_ref[...]).astype(o_ref.dtype)


def fused_qkv(x, w, b):
    n, d_in = x.shape
    d_out = w.shape[1]
    rb = _pick_row_block(n)
    return pl.pallas_call(
        _qkv_kernel,
        grid=(n // rb,),
        in_specs=[pl.BlockSpec((rb, d_in), lambda i: (i, 0)),
                  pl.BlockSpec((d_in, d_out), lambda i: (0, 0)),   # weight resident
                  pl.BlockSpec((1, d_out), lambda i: (0, 0))],
        out_specs=pl.BlockSpec((rb, d_out), lambda i: (i, 0)),
        out_shape=jax.ShapeDtypeStruct((n, d_out), x.dtype),
        compiler_params=_CPARAMS,
    )(x, w, b.reshape(1, d_out))


# ---------------------------------------------------------------------------
# Kernel 2: multi-head scaled-dot-product attention (all heads per grid step)
# ---------------------------------------------------------------------------

def _mha_attention_kernel(qkv_ref, ctx_ref, *maybe_attn_ref,
                          n_head, d_k, d_v, inv_temperature, return_attn):
    attn_ref = maybe_attn_ref[0] if return_attn else None
    h_dk = n_head * d_k

    for h in range(n_head):  # static unroll over heads
        q = qkv_ref[0, :, h * d_k:(h + 1) * d_k]                      # (S, dk)
        k = qkv_ref[0, :, h_dk + h * d_k: h_dk + (h + 1) * d_k]       # (S, dk)
        v = qkv_ref[0, :, 2 * h_dk + h * d_v: 2 * h_dk + (h + 1) * d_v]  # (S, dv)

        # q @ k^T without materializing a transpose (contract last dims).
        scores = jax.lax.dot_general(
            q, k, (((1,), (1,)), ((), ())),
            preferred_element_type=jnp.float32) * inv_temperature      # (S, S)

        m = jnp.max(scores, axis=-1, keepdims=True)
        e = jnp.exp(scores - m)
        denom = jnp.sum(e, axis=-1, keepdims=True)
        p = e * pl.reciprocal(denom, approx=True)                      # EUP recip

        out_h = jnp.dot(p, v, preferred_element_type=jnp.float32)      # (S, dv)
        ctx_ref[0, :, h * d_v:(h + 1) * d_v] = out_h.astype(ctx_ref.dtype)
        if return_attn:
            attn_ref[h, 0] = p.astype(attn_ref.dtype)


def mha_attention(qkv, *, n_head, d_k, d_v, return_attn=True):
    b, s, w = qkv.shape
    kern = functools.partial(
        _mha_attention_kernel,
        n_head=n_head, d_k=d_k, d_v=d_v,
        inv_temperature=1.0 / (float(d_k) ** 0.5),
        return_attn=return_attn)

    out_specs = [pl.BlockSpec((1, s, n_head * d_v), lambda i: (i, 0, 0))]
    out_shape = [jax.ShapeDtypeStruct((b, s, n_head * d_v), qkv.dtype)]
    if return_attn:
        out_specs.append(pl.BlockSpec((n_head, 1, s, s), lambda i: (0, i, 0, 0)))
        out_shape.append(jax.ShapeDtypeStruct((n_head, b, s, s), qkv.dtype))

    outs = pl.pallas_call(
        kern,
        grid=(b,),
        in_specs=[pl.BlockSpec((1, s, w), lambda i: (i, 0, 0))],
        out_specs=out_specs,
        out_shape=out_shape,
        compiler_params=_CPARAMS,
    )(qkv)
    ctx = outs[0]
    attn = outs[1] if return_attn else None
    return ctx, attn


# ---------------------------------------------------------------------------
# Kernel 3: output projection + residual add + LayerNorm (fused)
# ---------------------------------------------------------------------------

def _proj_add_ln_kernel(x_ref, w_ref, b_ref, res_ref, g_ref, beta_ref, o_ref, *, eps):
    y = jnp.dot(x_ref[...], w_ref[...], preferred_element_type=jnp.float32) + b_ref[...]
    z = y + res_ref[...]
    mean = jnp.mean(z, axis=-1, keepdims=True)
    var = jnp.mean(jnp.square(z - mean), axis=-1, keepdims=True)
    z = (z - mean) * jax.lax.rsqrt(var + eps)
    o_ref[...] = (z * g_ref[...] + beta_ref[...]).astype(o_ref.dtype)


def proj_add_layernorm(x, w, b, residual, gamma, beta, eps=1e-5):
    n, d_in = x.shape
    d_out = w.shape[1]
    rb = _pick_row_block(n)
    kern = functools.partial(_proj_add_ln_kernel, eps=eps)
    return pl.pallas_call(
        kern,
        grid=(n // rb,),
        in_specs=[pl.BlockSpec((rb, d_in), lambda i: (i, 0)),
                  pl.BlockSpec((d_in, d_out), lambda i: (0, 0)),
                  pl.BlockSpec((1, d_out), lambda i: (0, 0)),
                  pl.BlockSpec((rb, d_out), lambda i: (i, 0)),
                  pl.BlockSpec((1, d_out), lambda i: (0, 0)),
                  pl.BlockSpec((1, d_out), lambda i: (0, 0))],
        out_specs=pl.BlockSpec((rb, d_out), lambda i: (i, 0)),
        out_shape=jax.ShapeDtypeStruct((n, d_out), x.dtype),
        compiler_params=_CPARAMS,
    )(x, w, b.reshape(1, d_out), residual, gamma.reshape(1, d_out), beta.reshape(1, d_out))


# ---------------------------------------------------------------------------
# Kernel 4: position-wise FFN + residual add + LayerNorm (fused)
# ---------------------------------------------------------------------------

def _ffn_add_ln_kernel(x_ref, w1_ref, b1_ref, w2_ref, b2_ref, g_ref, beta_ref, o_ref, *, eps):
    x = x_ref[...]
    h = jnp.dot(x, w1_ref[...], preferred_element_type=jnp.float32) + b1_ref[...]
    h = jnp.maximum(h, 0.0)
    y = jnp.dot(h, w2_ref[...], preferred_element_type=jnp.float32) + b2_ref[...]
    z = y + x                                           # residual = FFN input
    mean = jnp.mean(z, axis=-1, keepdims=True)
    var = jnp.mean(jnp.square(z - mean), axis=-1, keepdims=True)
    z = (z - mean) * jax.lax.rsqrt(var + eps)
    o_ref[...] = (z * g_ref[...] + beta_ref[...]).astype(o_ref.dtype)


def ffn_add_layernorm(x, w1, b1, w2, b2, gamma, beta, eps=1e-5):
    n, d = x.shape
    dh = w1.shape[1]
    rb = _pick_row_block(n)
    kern = functools.partial(_ffn_add_ln_kernel, eps=eps)
    return pl.pallas_call(
        kern,
        grid=(n // rb,),
        in_specs=[pl.BlockSpec((rb, d), lambda i: (i, 0)),
                  pl.BlockSpec((d, dh), lambda i: (0, 0)),
                  pl.BlockSpec((1, dh), lambda i: (0, 0)),
                  pl.BlockSpec((dh, d), lambda i: (0, 0)),
                  pl.BlockSpec((1, d), lambda i: (0, 0)),
                  pl.BlockSpec((1, d), lambda i: (0, 0)),
                  pl.BlockSpec((1, d), lambda i: (0, 0))],
        out_specs=pl.BlockSpec((rb, d), lambda i: (i, 0)),
        out_shape=jax.ShapeDtypeStruct((n, d), x.dtype),
        compiler_params=_CPARAMS,
    )(x, w1, b1.reshape(1, dh), w2, b2.reshape(1, d),
      gamma.reshape(1, d), beta.reshape(1, d))


# ---------------------------------------------------------------------------
# EncoderLayer forward
# ---------------------------------------------------------------------------

def encoder_layer(enc_input, params, *, n_head, d_k, d_v, return_attn=True):
    B, S, D = enc_input.shape
    N = B * S
    x2d = enc_input.reshape(N, D)

    # One-time weight preprocessing: concat QKV and pre-transpose everything to
    # (Din, Dout) so kernels never transpose.
    w_qkv = jnp.concatenate([params["w_qs"], params["w_ks"], params["w_vs"]], axis=0).T
    b_qkv = jnp.concatenate([params["b_qs"], params["b_ks"], params["b_vs"]], axis=0)

    # 1) fused QKV projection: (N, 2*H*dk + H*dv)
    qkv = fused_qkv(x2d, w_qkv, b_qkv)

    # 2) attention over all heads; reads fused QKV directly (no head transposes).
    ctx, attn = mha_attention(qkv.reshape(B, S, -1),
                              n_head=n_head, d_k=d_k, d_v=d_v,
                              return_attn=return_attn)

    # 3) output projection + residual + LayerNorm1 (fused)
    mha_out = proj_add_layernorm(ctx.reshape(N, n_head * d_v),
                                 params["w_fc"].T, params["b_fc"],
                                 x2d, params["ln1_g"], params["ln1_b"])

    # 4) FFN + residual + LayerNorm2 (fused)
    enc_out = ffn_add_layernorm(mha_out,
                                params["w1"].T, params["b1"],
                                params["w2"].T, params["b2"],
                                params["ln2_g"], params["ln2_b"])

    if return_attn:
        # (H, B, S, S) -> (H*B, S, S): matches the PyTorch impl; pure reshape, no transpose.
        attn = attn.reshape(n_head * B, S, S)
    return enc_out.reshape(B, S, D), attn


# ---------------------------------------------------------------------------
# Pure-JAX reference (for sanity check)
# ---------------------------------------------------------------------------

def encoder_layer_ref(enc_input, p, *, n_head, d_k, d_v):
    B, S, D = enc_input.shape
    xf = enc_input.reshape(B * S, D)

    def lin(x, w, b):
        return x @ w.T + b

    def ln(x, g, b, eps=1e-5):
        m = x.mean(-1, keepdims=True)
        v = ((x - m) ** 2).mean(-1, keepdims=True)
        return (x - m) / jnp.sqrt(v + eps) * g + b

    q = lin(xf, p["w_qs"], p["b_qs"]).reshape(B, S, n_head, d_k).transpose(2, 0, 1, 3).reshape(-1, S, d_k)
    k = lin(xf, p["w_ks"], p["b_ks"]).reshape(B, S, n_head, d_k).transpose(2, 0, 1, 3).reshape(-1, S, d_k)
    v = lin(xf, p["w_vs"], p["b_vs"]).reshape(B, S, n_head, d_v).transpose(2, 0, 1, 3).reshape(-1, S, d_v)
    scores = jnp.einsum("bqd,bkd->bqk", q, k) / (float(d_k) ** 0.5)
    attn = jax.nn.softmax(scores, axis=-1)
    out = jnp.einsum("bqk,bkd->bqd", attn, v)
    out = out.reshape(n_head, B, S, d_v).transpose(1, 2, 0, 3).reshape(B * S, n_head * d_v)
    out = ln(lin(out, p["w_fc"], p["b_fc"]) + xf, p["ln1_g"], p["ln1_b"])
    h = jnp.maximum(lin(out, p["w1"], p["b1"]), 0.0)
    y = ln(lin(h, p["w2"], p["b2"]) + out, p["ln2_g"], p["ln2_b"])
    return y.reshape(B, S, D), attn


# ---------------------------------------------------------------------------
# Main
# ---------------------------------------------------------------------------

if __name__ == "__main__":
    B, S = 2, 8
    model_d, inner_d = 32, 64
    n_head, d_k, d_v = 2, 16, 16

    key = jax.random.PRNGKey(0)
    keys = jax.random.split(key, 16)

    def nrm(k, shape, scale=0.1):
        return (scale * jax.random.normal(k, shape)).astype(jnp.float32)

    params = {
        # MultiHeadAttention
        "w_qs": nrm(keys[0], (n_head * d_k, model_d)),
        "b_qs": nrm(keys[1], (n_head * d_k,)),
        "w_ks": nrm(keys[2], (n_head * d_k, model_d)),
        "b_ks": nrm(keys[3], (n_head * d_k,)),
        "w_vs": nrm(keys[4], (n_head * d_v, model_d)),
        "b_vs": nrm(keys[5], (n_head * d_v,)),
        "w_fc": nrm(keys[6], (model_d, n_head * d_v)),
        "b_fc": nrm(keys[7], (model_d,)),
        "ln1_g": jnp.ones((model_d,), jnp.float32),
        "ln1_b": jnp.zeros((model_d,), jnp.float32),
        # PositionWiseFeedForward (Conv1d k=1 weights, squeezed to 2-D)
        "w1": nrm(keys[8], (inner_d, model_d)),
        "b1": nrm(keys[9], (inner_d,)),
        "w2": nrm(keys[10], (model_d, inner_d)),
        "b2": nrm(keys[11], (model_d,)),
        "ln2_g": jnp.ones((model_d,), jnp.float32),
        "ln2_b": jnp.zeros((model_d,), jnp.float32),
    }

    enc_input = jax.random.normal(keys[12], (B, S, model_d), dtype=jnp.float32)

    enc_out, enc_attn = encoder_layer(enc_input, params,
                                      n_head=n_head, d_k=d_k, d_v=d_v,
                                      return_attn=True)
    enc_out = jax.block_until_ready(enc_out)
    enc_attn = jax.block_until_ready(enc_attn)

    ref_out, ref_attn = encoder_layer_ref(enc_input, params,
                                          n_head=n_head, d_k=d_k, d_v=d_v)
    assert enc_out.shape == (B, S, model_d)
    assert enc_attn.shape == (n_head * B, S, S)
    # Tolerances loosened slightly vs exact-divide version because the softmax
    # denominator uses the EUP approximate reciprocal (pl.reciprocal(approx=True)).
    assert jnp.allclose(enc_out, ref_out, atol=5e-3, rtol=5e-3)
    assert jnp.allclose(enc_attn, ref_attn, atol=5e-3, rtol=5e-3)

    print("KERNEL_OK")
</pallas_src>

<mosaic_0001>
module attributes {stable_mosaic.version = 11 : i64} {
  func.func @_qkv_kernel(%arg0: i32, %arg1: memref<16x32xf32, #tpu.memory_space<vmem>>, %arg2: memref<32x96xf32, #tpu.memory_space<vmem>>, %arg3: memref<1x96xf32, #tpu.memory_space<vmem>>, %arg4: memref<16x96xf32, #tpu.memory_space<vmem>>) attributes {dimension_semantics = [#tpu.dimension_semantics<parallel>], iteration_bounds = array<i64: 1>, scalar_prefetch = 0 : i64, scratch_operands = 0 : i64, tpu.core_type = #tpu.core_type<tc>, window_params = [{transform_indices = @transform_0, window_bounds = array<i64: 16, 32>}, {pipeline_mode = #tpu.pipeline_mode<synchronous>, transform_indices = @transform_1, window_bounds = array<i64: 32, 96>}, {pipeline_mode = #tpu.pipeline_mode<synchronous>, transform_indices = @transform_2, window_bounds = array<i64: 1, 96>}, {transform_indices = @transform_3, window_bounds = array<i64: 16, 96>}]} {
    %c0 = arith.constant 0 : index
    %c0_0 = arith.constant 0 : index
    %0 = vector.load %arg1[%c0, %c0_0] : memref<16x32xf32, #tpu.memory_space<vmem>>, vector<16x32xf32>
    %c0_1 = arith.constant 0 : index
    %c0_2 = arith.constant 0 : index
    %1 = vector.load %arg2[%c0_1, %c0_2] : memref<32x96xf32, #tpu.memory_space<vmem>>, vector<32x96xf32>
    %cst = arith.constant dense<0.000000e+00> : vector<16x96xf32>
    %2 = tpu.matmul %0, %1, %cst {dimension_numbers = #tpu.dot_dimension_numbers<[1], [0], [0], [1], [0, 0, 1, 1], [], []>} : vector<16x32xf32>, vector<32x96xf32>, vector<16x96xf32> -> vector<16x96xf32>
    %c0_3 = arith.constant 0 : index
    %c0_4 = arith.constant 0 : index
    %3 = vector.load %arg3[%c0_3, %c0_4] : memref<1x96xf32, #tpu.memory_space<vmem>>, vector<1x96xf32>
    %4 = vector.broadcast %3 : vector<1x96xf32> to vector<16x96xf32>
    %5 = arith.addf %2, %4 : vector<16x96xf32>
    %c0_5 = arith.constant 0 : index
    %c0_6 = arith.constant 0 : index
    %6 = vector.load %arg4[%c0_5, %c0_6] : memref<16x96xf32, #tpu.memory_space<vmem>>, vector<16x96xf32>
    tpu.vector_store %arg4[%c0_5, %c0_6], %5 {strides = array<i32>} : memref<16x96xf32, #tpu.memory_space<vmem>>, vector<16x96xf32>,
    return
  }
  func.func @transform_0(%arg0: i32) -> (i32, i32) {
    %c0_i32 = arith.constant 0 : i32
    %c0_i32_0 = arith.constant 0 : i32
    return %arg0, %c0_i32 : i32, i32
  }
  func.func @transform_1(%arg0: i32) -> (i32, i32) {
    %c0_i32 = arith.constant 0 : i32
    %c0_i32_0 = arith.constant 0 : i32
    %c0_i32_1 = arith.constant 0 : i32
    return %c0_i32, %c0_i32_0 : i32, i32
  }
  func.func @transform_2(%arg0: i32) -> (i32, i32) {
    %c0_i32 = arith.constant 0 : i32
    %c0_i32_0 = arith.constant 0 : i32
    %c0_i32_1 = arith.constant 0 : i32
    return %c0_i32, %c0_i32_0 : i32, i32
  }
  func.func @transform_3(%arg0: i32) -> (i32, i32) {
    %c0_i32 = arith.constant 0 : i32
    %c0_i32_0 = arith.constant 0 : i32
    return %arg0, %c0_i32 : i32, i32
  }
}

</mosaic_0001>

<bundles_post_ra>
// kernel: tpu_custom_call.1
= control target key start
LH: loop header
LB: loop body
LE: loop exit
PB: predicated region body
PF: predicated region fallthrough
CT: control target
= control target key end

     0   :  { %8 = vsyncpa [#allocation3], 0  ;;  %s298_s0 = inlined_call_operand.hbm [shape: f32[16,32], index: 0, kind: input, shape index: {}]   ;;  %s299_s1 = inlined_call_operand.hbm [shape: f32[32,96], index: 1, kind: input, shape index: {}]   ;;  %s300_s2 = inlined_call_operand.vmem [shape: f32[1,96], index: 2, kind: input, shape index: {}]   ;;  %s301_s3 = inlined_call_operand.hbm [shape: f32[16,96], index: 3, kind: output, shape index: {}]  }
   0x1   :  { %9 = vsyncpa [#allocation6], 0 }
   0x2   :  { %10 = vsyncpa [#allocation4], 0  ;;  %s250_s12 = smov [#allocation2]  }
   0x3   :  { %s16_s13 = sshll.u32 %s250_s12, 4  ;;  %s17_s13 = int_to_ptr.vmem [resolvable:$true] %s16_s13 }
   0x4   :  { %s192_s14 = scalar_lea.vmem %s17_s13, 256  ;;  %p197_p1 = scmp.lt.s32.totalorder %s17_s13, %s17_s13 }
   0x5   :  { %p193_p0 = scmp.ne.s32.totalorder %s17_s13, %s192_s14  ;;  %p198_p2 = scmp.lt.s32.totalorder %s192_s14, %s192_s14 }
   0x7   :  { %p199_p3 = por %p198_p2, %p197_p1 }
   0x9   :  { %p200_p4 = pnand %p199_p3, %p193_p0 }
   0xb   :  { %203 = shalt.err (!%p200_p4)
}
   0xc   :  { %s251_s15 = smov 128   ;;  %s252_s16 = smov 8  }
   0xd   :  { %22 = dma.hbm_to_vmem [thread:$0]  %s298_s0, 256, %s17_s13, [#allocation3], %s251_s15, %s251_s15, %s252_s16  }
   0xe   :  { %s253_s19 = smov [#allocation5]  }
   0xf   :  { %s28_s20 = sshll.u32 %s253_s19, 4  ;;  %s29_s20 = int_to_ptr.vmem [resolvable:$true] %s28_s20 }
  0x10   :  { %s212_s21 = scalar_lea.vmem %s29_s20, 512  ;;  %p217_p6 = scmp.lt.s32.totalorder %s29_s20, %s29_s20 }
  0x11   :  { %p213_p5 = scmp.ne.s32.totalorder %s29_s20, %s212_s21  ;;  %p218_p7 = scmp.lt.s32.totalorder %s212_s21, %s212_s21 }
  0x13   :  { %p219_p8 = por %p218_p7, %p217_p6 }
  0x15   :  { %p220_p9 = pnand %p219_p8, %p213_p5 }
  0x17   :  { %223 = shalt.err (!%p220_p9)
}
  0x18   :  { %34 = dma.hbm_to_vmem [thread:$0]  %s299_s1, 512, %s29_s20, [#allocation6], %s251_s15, %s251_s15, %s252_s16  }
  0x19   :  { %244 = dma.done.wait [#allocation3], 256  }
  0x1a   :  { %245 = vsyncadd [#allocation3], 4294967040 }
  0x1b   :  { %246 = dma.done.wait [#allocation6], 512  }
  0x1c   :  { %247 = vsyncadd [#allocation6], 4294966784  ;;  %vm56_vm0 = vcmask 261120   ;;  %v48_v0 = vld [vmem:[#allocation5 + $0x18] sm:$0xff]  ;;  %v47_v1 = vld [vmem:[#allocation5 + $0x10] sm:$0xff]  ;;  %vm138_vm1 = vcmask 785408  }
  0x1d   :  { %168 = vmatprep.subr.mxu0 %v48_v0  ;;  %v43_v2 = vld [vmem:[#allocation2] sm:$0xff]  ;;  %v46_v3 = vld [vmem:[#allocation5 + $0x8] sm:$0xff]  ;;  %v45_v4 = vld [vmem:[#allocation5] sm:$0xff]  ;;  %s254_s24 = smov [#allocation7]  }
  0x1e   :  { %169 = vmatpush3.msra.mxu0 %v48_v0  ;;  %176 = vmatprep.mubr.msk.f32.mxu0 %vm56_vm0, %v43_v2  ;;  %v44_v5 = vld [vmem:[#allocation2 + $0x8] sm:$0xff]  ;;  %v159_v6 = vld [vmem:[%s300_s2] ss:$0 sm:$0xff]  ;;  %s146_s25 = sshll.u32 %s254_s24, 4  ;;  %s147_s25 = int_to_ptr.vmem [resolvable:$true] %s146_s25 }
  0x1f   :  { %170 = vmatprep.subr.mxu0 %v47_v1  ;;  %s224_s26 = scalar_lea.vmem %s147_s25, 256  ;;  %p229_p11 = scmp.lt.s32.totalorder %s147_s25, %s147_s25 }
  0x20   :  { %171 = vmatpush3.msra.mxu0 %v47_v1  ;;  %p225_p10 = scmp.ne.s32.totalorder %s147_s25, %s224_s26  ;;  %p230_p12 = scmp.lt.s32.totalorder %s224_s26, %s224_s26 }
  0x21   :  { %172 = vmatprep.subr.mxu0 %v46_v3 }
  0x22   :  { %173 = vmatpush3.msra.mxu0 %v46_v3  ;;  %p231_p13 = por %p230_p12, %p229_p11 }
  0x23   :  { %174 = vmatprep.subr.mxu0 %v45_v4 }
  0x24   :  { %175 = vmatpush3.msra.mxu0 %v45_v4  ;;  %p232_p0 = pnand %p231_p13, %p225_p10 }
  0x25   :  { %177 = vmatmul.mubr.msk.f32.vlgmr.msra.gmra.mxu0 %vm56_vm0, %v44_v5 }
  0xe5   :  { %v178_v7 = vpop.f32.mrf.mxu0 }
  0xe6   :  { %v135_v8 = vadd.f32 %v178_v7, %v159_v6 }
  0xe7   :  { %v129_v9 = vpop.f32.mrf.mxu0 }
  0xe8   :  { %v130_v10 = vadd.f32 %v159_v6, %v129_v9  ;;  %140 = vst.msk [vmem:[#allocation7 + $0x8] sm:$0xff] %vm138_vm1, %v135_v8 }
  0xea   :  { %139 = vst.msk [vmem:[#allocation7] sm:$0xff] %vm138_vm1, %v130_v10 }
  0xeb   :  { %235 = shalt.err (!%p232_p0)
}
  0xec   :  { %152 = dma.vmem_to_hbm [thread:$0]  %s147_s25, 256, %s301_s3, [#allocation4], %s251_s15, %s251_s15, %s252_s16  }
  0xed   :  { %248 = dma.done.wait [#allocation4], 256  }
  0xee   :  { %249 = vsyncadd [#allocation4], 4294967040 }
  0xef   :  { %156 = vsyncpa [#allocation3], 1 }
  0xf0   :  { %157 = vsyncpa [#allocation6], 1 }
  0xf1   :  { %158 = vsyncpa [#allocation4], 1 }

</bundles_post_ra>
